<compile_context>
chip_gen: v5e
topology: v5e:2x2
jax: 0.10.0
libtpu: 0.0.40
codegen_flags: <defaults>
</compile_context>

<pallas_src>
import jax
import jax.numpy as jnp
from jax.experimental import pallas as pl
from jax.experimental.pallas import tpu as pltpu


def _round_up(n, m):
    return ((n + m - 1) // m) * m


def mlp_softmax_kernel(x_ref, w1_ref, b1_ref, w2_ref, b2_ref, out_ref):
    # fc1: bf16 inputs, f32 accumulation on the MXU.
    z1 = jnp.dot(x_ref[...], w1_ref[...], preferred_element_type=jnp.float32)
    z1 = z1 + b1_ref[...]                      # (1, Hpad) broadcasts once, f32
    a1 = jnp.maximum(z1, 0.0)                  # relu, f32 on the VPU
    # fc2: small (Hpad x Opad) matmul kept in f32 for accuracy.
    z2 = jnp.dot(a1, w2_ref[...], preferred_element_type=jnp.float32) + b2_ref[...]
    # Max-stabilized softmax over the (padded, lane-dense) last axis.
    m = jnp.max(z2, axis=-1, keepdims=True)
    e = jnp.exp(z2 - m)                        # padded lanes: exp(-1e30 - m) == 0
    s = jnp.sum(e, axis=-1, keepdims=True)
    out_ref[...] = (e * pl.reciprocal(s, approx=True)).astype(out_ref.dtype)


def simple_nn_forward(x, w1, b1, w2, b2, *, tile_b=512):
    """x: [B, in]; w1: [in, hidden]; b1: [hidden] or [1, hidden]; w2: [hidden, out]; b2 likewise."""
    B, in_size = x.shape
    hidden = w1.shape[1]
    out_size = w2.shape[1]

    LANE = 128
    h_pad = _round_up(hidden, LANE)
    o_pad = _round_up(out_size, LANE)

    # One-time lane-dense padding of parameters (outside the kernel).
    w1_p = jnp.zeros((in_size, h_pad), jnp.bfloat16).at[:, :hidden].set(
        w1.astype(jnp.bfloat16))
    b1_p = jnp.zeros((1, h_pad), jnp.float32).at[:, :hidden].set(
        jnp.asarray(b1, jnp.float32).reshape(1, -1))
    w2_p = jnp.zeros((h_pad, o_pad), jnp.float32).at[:hidden, :out_size].set(
        jnp.asarray(w2, jnp.float32))
    # Padded output logits get -1e30 so they contribute ~0 to the softmax.
    b2_p = jnp.full((1, o_pad), -1e30, jnp.float32).at[:, :out_size].set(
        jnp.asarray(b2, jnp.float32).reshape(1, -1))

    # Batch tile: multiple of 8 sublanes, capped by tile_b (sized for v7x's 64 MiB VMEM).
    tb = _round_up(min(tile_b, _round_up(B, 8)), 8)
    b_pad = _round_up(B, tb)
    x_p = x.astype(jnp.bfloat16)
    if b_pad != B:
        x_p = jnp.pad(x_p, ((0, b_pad - B), (0, 0)))

    grid = (b_pad // tb,)
    out = pl.pallas_call(
        mlp_softmax_kernel,
        out_shape=jax.ShapeDtypeStruct((b_pad, o_pad), jnp.float32),
        grid_spec=pl.GridSpec(
            grid=grid,
            in_specs=[
                pl.BlockSpec((tb, in_size), lambda i: (i, 0)),     # x: tiled over batch
                pl.BlockSpec((in_size, h_pad), lambda i: (0, 0)),  # W1: VMEM-resident
                pl.BlockSpec((1, h_pad), lambda i: (0, 0)),        # b1
                pl.BlockSpec((h_pad, o_pad), lambda i: (0, 0)),    # W2
                pl.BlockSpec((1, o_pad), lambda i: (0, 0)),        # b2
            ],
            out_specs=pl.BlockSpec((tb, o_pad), lambda i: (i, 0)),
        ),
        compiler_params=pltpu.CompilerParams(
            dimension_semantics=("parallel",),     # shard batch tiles across TCs (v7x)
        ),
    )(x_p, w1_p, b1_p, w2_p, b2_p)

    return out[:B, :out_size]


def init_params(key, input_size=784, hidden_size=10, output_size=10):
    # Deterministic init mimicking torch.nn.Linear default (uniform +/- 1/sqrt(fan_in)).
    k1, k2, k3, k4 = jax.random.split(key, 4)
    bound1 = 1.0 / jnp.sqrt(input_size)
    bound2 = 1.0 / jnp.sqrt(hidden_size)
    # Stored as [in, out] (transpose of torch's [out, in]) so the kernel does x @ W.
    w1 = jax.random.uniform(k1, (input_size, hidden_size), jnp.float32, -bound1, bound1)
    b1 = jax.random.uniform(k2, (1, hidden_size), jnp.float32, -bound1, bound1)
    w2 = jax.random.uniform(k3, (hidden_size, output_size), jnp.float32, -bound2, bound2)
    b2 = jax.random.uniform(k4, (1, output_size), jnp.float32, -bound2, bound2)
    return w1, b1, w2, b2


# TODO(synk): fit()/evaluate() (SGD training loop, CrossEntropyLoss) are not part of the
# forward pass and are not translated; only forward() is implemented as a kernel.

if __name__ == "__main__":
    key = jax.random.PRNGKey(0)
    kx, kp = jax.random.split(key)

    input_size, hidden_size, output_size = 784, 10, 10
    batch = 8
    x = jax.random.normal(kx, (batch, input_size), jnp.float32)
    w1, b1, w2, b2 = init_params(kp, input_size, hidden_size, output_size)

    out = simple_nn_forward(x, w1, b1, w2, b2)
    out = jax.block_until_ready(out)

    # Reference check in plain f32 JAX (kernel uses bf16 fc1 + approx reciprocal,
    # so tolerances are relaxed accordingly).
    z1 = jnp.maximum(x @ w1 + b1, 0.0)
    z2 = z1 @ w2 + b2
    ref = jax.nn.softmax(z2, axis=1)
    assert out.shape == (batch, output_size)
    assert jnp.allclose(out, ref, atol=2e-2, rtol=2e-2)
    assert jnp.allclose(jnp.sum(out, axis=1), 1.0, atol=5e-3)
    assert jnp.array_equal(jnp.argmax(out, axis=1), jnp.argmax(ref, axis=1))

    print("KERNEL_OK")
</pallas_src>

<mosaic_0001>
module attributes {stable_mosaic.version = 11 : i64} {
  func.func @mlp_softmax_kernel(%arg0: i32, %arg1: memref<8x784xbf16, #tpu.memory_space<vmem>>, %arg2: memref<784x128xbf16, #tpu.memory_space<vmem>>, %arg3: memref<1x128xf32, #tpu.memory_space<vmem>>, %arg4: memref<128x128xf32, #tpu.memory_space<vmem>>, %arg5: memref<1x128xf32, #tpu.memory_space<vmem>>, %arg6: memref<8x128xf32, #tpu.memory_space<vmem>>) attributes {dimension_semantics = [#tpu.dimension_semantics<parallel>], iteration_bounds = array<i64: 1>, scalar_prefetch = 0 : i64, scratch_operands = 0 : i64, tpu.core_type = #tpu.core_type<tc>, window_params = [{transform_indices = @transform_0, window_bounds = array<i64: 8, 784>}, {pipeline_mode = #tpu.pipeline_mode<synchronous>, transform_indices = @transform_1, window_bounds = array<i64: 784, 128>}, {pipeline_mode = #tpu.pipeline_mode<synchronous>, transform_indices = @transform_2, window_bounds = array<i64: 1, 128>}, {pipeline_mode = #tpu.pipeline_mode<synchronous>, transform_indices = @transform_3, window_bounds = array<i64: 128, 128>}, {pipeline_mode = #tpu.pipeline_mode<synchronous>, transform_indices = @transform_4, window_bounds = array<i64: 1, 128>}, {transform_indices = @transform_5, window_bounds = array<i64: 8, 128>}]} {
    %c0 = arith.constant 0 : index
    %c0_0 = arith.constant 0 : index
    %0 = vector.load %arg1[%c0, %c0_0] : memref<8x784xbf16, #tpu.memory_space<vmem>>, vector<8x784xbf16>
    %c0_1 = arith.constant 0 : index
    %c0_2 = arith.constant 0 : index
    %1 = vector.load %arg2[%c0_1, %c0_2] : memref<784x128xbf16, #tpu.memory_space<vmem>>, vector<784x128xbf16>
    %cst = arith.constant dense<0.000000e+00> : vector<8x128xf32>
    %2 = tpu.matmul %0, %1, %cst {dimension_numbers = #tpu.dot_dimension_numbers<[1], [0], [0], [1], [0, 0, 1, 1], [], []>} : vector<8x784xbf16>, vector<784x128xbf16>, vector<8x128xf32> -> vector<8x128xf32>
    %c0_3 = arith.constant 0 : index
    %c0_4 = arith.constant 0 : index
    %3 = vector.load %arg3[%c0_3, %c0_4] : memref<1x128xf32, #tpu.memory_space<vmem>>, vector<1x128xf32>
    %4 = vector.broadcast %3 : vector<1x128xf32> to vector<8x128xf32>
    %5 = arith.addf %2, %4 : vector<8x128xf32>
    %cst_5 = arith.constant 0.000000e+00 : f32
    %6 = vector.broadcast %cst_5 : f32 to vector<8x128xf32>
    %7 = arith.maximumf %5, %6 : vector<8x128xf32>
    %c0_6 = arith.constant 0 : index
    %c0_7 = arith.constant 0 : index
    %8 = vector.load %arg4[%c0_6, %c0_7] : memref<128x128xf32, #tpu.memory_space<vmem>>, vector<128x128xf32>
    %cst_8 = arith.constant dense<0.000000e+00> : vector<8x128xf32>
    %9 = tpu.matmul %7, %8, %cst_8 {dimension_numbers = #tpu.dot_dimension_numbers<[1], [0], [0], [1], [0, 0, 1, 1], [], []>} : vector<8x128xf32>, vector<128x128xf32>, vector<8x128xf32> -> vector<8x128xf32>
    %c0_9 = arith.constant 0 : index
    %c0_10 = arith.constant 0 : index
    %10 = vector.load %arg5[%c0_9, %c0_10] : memref<1x128xf32, #tpu.memory_space<vmem>>, vector<1x128xf32>
    %11 = vector.broadcast %10 : vector<1x128xf32> to vector<8x128xf32>
    %12 = arith.addf %9, %11 : vector<8x128xf32>
    %cst_11 = arith.constant dense<0xFF800000> : vector<8xf32>
    %13 = vector.multi_reduction <maximumf>, %12, %cst_11 [1] : vector<8x128xf32> to vector<8xf32>
    %14 = vector.shape_cast %13 : vector<8xf32> to vector<8x1xf32>
    %15 = vector.broadcast %14 : vector<8x1xf32> to vector<8x128xf32>
    %16 = arith.subf %12, %15 : vector<8x128xf32>
    %17 = math.exp %16 : vector<8x128xf32>
    %cst_12 = arith.constant dense<0.000000e+00> : vector<8xf32>
    %18 = vector.multi_reduction <add>, %17, %cst_12 [1] : vector<8x128xf32> to vector<8xf32>
    %19 = vector.shape_cast %18 : vector<8xf32> to vector<8x1xf32>
    %20 = tpu.reciprocal %19 {approx = true} : vector<8x1xf32> -> vector<8x1xf32>
    %21 = vector.broadcast %20 : vector<8x1xf32> to vector<8x128xf32>
    %22 = arith.mulf %17, %21 : vector<8x128xf32>
    %c0_13 = arith.constant 0 : index
    %c0_14 = arith.constant 0 : index
    %23 = vector.load %arg6[%c0_13, %c0_14] : memref<8x128xf32, #tpu.memory_space<vmem>>, vector<8x128xf32>
    tpu.vector_store %arg6[%c0_13, %c0_14], %22 {strides = array<i32>} : memref<8x128xf32, #tpu.memory_space<vmem>>, vector<8x128xf32>,
    return
  }
  func.func @transform_0(%arg0: i32) -> (i32, i32) {
    %c0_i32 = arith.constant 0 : i32
    %c0_i32_0 = arith.constant 0 : i32
    return %arg0, %c0_i32 : i32, i32
  }
  func.func @transform_1(%arg0: i32) -> (i32, i32) {
    %c0_i32 = arith.constant 0 : i32
    %c0_i32_0 = arith.constant 0 : i32
    %c0_i32_1 = arith.constant 0 : i32
    return %c0_i32, %c0_i32_0 : i32, i32
  }
  func.func @transform_2(%arg0: i32) -> (i32, i32) {
    %c0_i32 = arith.constant 0 : i32
    %c0_i32_0 = arith.constant 0 : i32
    %c0_i32_1 = arith.constant 0 : i32
    return %c0_i32, %c0_i32_0 : i32, i32
  }
  func.func @transform_3(%arg0: i32) -> (i32, i32) {
    %c0_i32 = arith.constant 0 : i32
    %c0_i32_0 = arith.constant 0 : i32
    %c0_i32_1 = arith.constant 0 : i32
    return %c0_i32, %c0_i32_0 : i32, i32
  }
  func.func @transform_4(%arg0: i32) -> (i32, i32) {
    %c0_i32 = arith.constant 0 : i32
    %c0_i32_0 = arith.constant 0 : i32
    %c0_i32_1 = arith.constant 0 : i32
    return %c0_i32, %c0_i32_0 : i32, i32
  }
  func.func @transform_5(%arg0: i32) -> (i32, i32) {
    %c0_i32 = arith.constant 0 : i32
    %c0_i32_0 = arith.constant 0 : i32
    return %arg0, %c0_i32 : i32, i32
  }
}

</mosaic_0001>

<bundles_post_ra>
// kernel: tpu_custom_call.1
= control target key start
LH: loop header
LB: loop body
LE: loop exit
PB: predicated region body
PF: predicated region fallthrough
CT: control target
= control target key end

     0   :  { %10 = vsyncpa [#allocation3], 0  ;;  %s1073_s0 = inlined_call_operand.hbm [shape: bf16[8,784], index: 0, kind: input, shape index: {}]   ;;  %s1074_s1 = inlined_call_operand.hbm [shape: bf16[784,128], index: 1, kind: input, shape index: {}]   ;;  %s1075_s2 = inlined_call_operand.vmem [shape: f32[1,128], index: 2, kind: input, shape index: {}]   ;;  %s1076_s3 = inlined_call_operand.hbm [shape: f32[128,128], index: 3, kind: input, shape index: {}]   ;;  %s1077_s4 = inlined_call_operand.vmem [shape: f32[1,128], index: 4, kind: input, shape index: {}]   ;;  %s1078_s5 = inlined_call_operand.hbm [shape: f32[8,128], index: 5, kind: output, shape index: {}]  }
   0x1   :  { %11 = vsyncpa [#allocation6], 0  ;;  %s28_s20 = sshll.u32 %s1074_s1, 4  ;;  %s29_s20 = int_to_ptr.hbm [resolvable:$true] %s28_s20 }
   0x2   :  { %12 = vsyncpa [#allocation4], 0  ;;  %s1017_s21 = smov [#allocation5]   ;;  %s18_s25 = sshll.u32 %s1073_s0, 4  ;;  %s19_s25 = int_to_ptr.hbm [resolvable:$true] %s18_s25 }
   0x3   :  { %s30_s22 = sshll.u32 %s1017_s21, 4  ;;  %s1018_s26 = smov 64   ;;  %s31_s22 = int_to_ptr.vmem [resolvable:$true] %s30_s22 }
   0x4   :  { %s1019_s27 = smov 4   ;;  %s1020_s28 = smov [#allocation2]  }
   0x5   :  { %36 = dma.hbm_to_vmem [thread:$0]  %s29_s20, 6272, %s31_s22, [#allocation6], %s1018_s26, %s1018_s26, %s1019_s27  }
   0x6   :  { %s20_s29 = sshll.u32 %s1020_s28, 4  ;;  %s43_s7 = sshll.u32 %s1076_s3, 4  ;;  %s21_s29 = int_to_ptr.vmem [resolvable:$true] %s20_s29  ;;  %s44_s7 = int_to_ptr.hbm [resolvable:$true] %s43_s7 }
   0x7   :  { %23 = dma.hbm_to_vmem [thread:$0]  %s19_s25, 448, %s21_s29, [#allocation3]  }
   0x8   :  { %s1021_s1 = smov [#allocation7]   ;;  %s1022_s9 = smov 128  }
   0x9   :  { %s45_s8 = sshll.u32 %s1021_s1, 4  ;;  %s1023_s10 = smov 8   ;;  %s46_s8 = int_to_ptr.vmem [resolvable:$true] %s45_s8 }
   0xa   :  { %51 = dma.hbm_to_vmem [thread:$0]  %s44_s7, 2048, %s46_s8, [#allocation6], %s1022_s9, %s1022_s9, %s1023_s10  }
   0xb   :  { %1011 = dma.done.wait [#allocation3], 448  }
   0xc   :  { %1012 = vsyncadd [#allocation3], 4294966848 }
   0xd   :  { %1013 = dma.done.wait [#allocation6], 8320  }
   0xe   :  { %1014 = vsyncadd [#allocation6], 4294958976  ;;  %v859_v0 = vld [vmem:[#allocation5 + $0x38] sm:$0xff]  ;;  %v858_v3 = vld [vmem:[#allocation5 + $0x30] sm:$0xff]  ;;  %vm491_vm0 = vcmask 130048   ;;  %s644_s16 = sshll.u32 %s1078_s5, 4  ;;  %s645_s16 = int_to_ptr.hbm [resolvable:$true] %s644_s16 }
   0xf   :  { %v867_v1 = vld [vmem:[#allocation5 + $0x78] sm:$0xff]  ;;  %495 = vmatpush.bf16.msra.mxu0 %v859_v0  ;;  %v866_v4 = vld [vmem:[#allocation5 + $0x70] sm:$0xff]  ;;  %v857_v8 = vld [vmem:[#allocation5 + $0x28] sm:$0xff] }
  0x10   :  { %v875_v2 = vld [vmem:[#allocation5 + $0xb8] sm:$0xff]  ;;  %508 = vmatpush.bf16.msra.mxu1 %v867_v1  ;;  %v874_v5 = vld [vmem:[#allocation5 + $0xb0] sm:$0xff]  ;;  %v865_v9 = vld [vmem:[#allocation5 + $0x68] sm:$0xff] }
  0x11   :  { %521 = vmatpush.bf16.msra.mxu2 %v875_v2  ;;  %v883_v6 = vld [vmem:[#allocation5 + $0xf8] sm:$0xff]  ;;  %v882_v7 = vld [vmem:[#allocation5 + $0xf0] sm:$0xff]  ;;  %v873_v10 = vld [vmem:[#allocation5 + $0xa8] sm:$0xff] }
  0x12   :  { %534 = vmatpush.bf16.msra.mxu3 %v883_v6  ;;  %v881_v11 = vld [vmem:[#allocation5 + $0xe8] sm:$0xff]  ;;  %v856_v12 = vld [vmem:[#allocation5 + $0x20] sm:$0xff]  ;;  %v855_v16 = vld [vmem:[#allocation5 + $0x18] sm:$0xff] }
  0x13   :  { %496 = vmatpush.bf16.msra.mxu0 %v858_v3  ;;  %v864_v13 = vld [vmem:[#allocation5 + $0x60] sm:$0xff]  ;;  %v863_v17 = vld [vmem:[#allocation5 + $0x58] sm:$0xff]  ;;  %v854_v20 = vld [vmem:[#allocation5 + $0x10] sm:$0xff] }
  0x14   :  { %509 = vmatpush.bf16.msra.mxu1 %v866_v4  ;;  %v872_v14 = vld [vmem:[#allocation5 + $0xa0] sm:$0xff]  ;;  %v871_v18 = vld [vmem:[#allocation5 + $0x98] sm:$0xff]  ;;  %v862_v21 = vld [vmem:[#allocation5 + $0x50] sm:$0xff] }
  0x15   :  { %522 = vmatpush.bf16.msra.mxu2 %v874_v5  ;;  %v880_v15 = vld [vmem:[#allocation5 + $0xe0] sm:$0xff]  ;;  %v879_v19 = vld [vmem:[#allocation5 + $0xd8] sm:$0xff]  ;;  %v870_v22 = vld [vmem:[#allocation5 + $0x90] sm:$0xff] }
  0x16   :  { %535 = vmatpush.bf16.msra.mxu3 %v882_v7  ;;  %v878_v23 = vld [vmem:[#allocation5 + $0xd0] sm:$0xff]  ;;  %v853_v24 = vld [vmem:[#allocation5 + $0x8] sm:$0xff]  ;;  %v852_v32 = vld [vmem:[#allocation5] sm:$0xff] }
  0x17   :  { %497 = vmatpush.bf16.msra.mxu0 %v857_v8  ;;  %v861_v25 = vld [vmem:[#allocation5 + $0x48] sm:$0xff]  ;;  %v860_v33 = vld [vmem:[#allocation5 + $0x40] sm:$0xff]  ;;  %v891_v34 = vld [vmem:[#allocation5 + $0x138] sm:$0xff] }
  0x18   :  { %510 = vmatpush.bf16.msra.mxu1 %v865_v9  ;;  %v67_v26 = vld [vmem:[#allocation2] sm:$0xff]  ;;  %v68_v28 = vld [vmem:[#allocation2 + $0x8] sm:$0xff]  ;;  %v899_v35 = vld [vmem:[#allocation5 + $0x178] sm:$0xff] }
  0x19   :  { %523 = vmatpush.bf16.msra.mxu2 %v873_v10  ;;  %v869_v27 = vld [vmem:[#allocation5 + $0x88] sm:$0xff]  ;;  %v177_v29 = vunpack.c.l.b16 %v67_v26  ;;  %v178_v31 = vunpack.c.h.b16 %v67_v26  ;;  %v868_v36 = vld [vmem:[#allocation5 + $0x80] sm:$0xff]  ;;  %v179_v37 = vunpack.c.l.b16 %v68_v28  ;;  %v180_v40 = vunpack.c.h.b16 %v68_v28  ;;  %v890_v43 = vld [vmem:[#allocation5 + $0x130] sm:$0xff] }
  0x1a   :  { %536 = vmatpush.bf16.msra.mxu3 %v881_v11  ;;  %v877_v30 = vld [vmem:[#allocation5 + $0xc8] sm:$0xff]  ;;  %v876_v41 = vld [vmem:[#allocation5 + $0xc0] sm:$0xff]  ;;  %v898_v44 = vld [vmem:[#allocation5 + $0x170] sm:$0xff] }
  0x1b   :  { %498 = vmatpush.bf16.msra.mxu0 %v856_v12  ;;  %v184_v38 = vpack.c.b16 %v177_v29, %v177_v29  ;;  %v185_v39 = vpack.c.b16 %v178_v31, %v178_v31  ;;  %v900_v42 = vld [vmem:[#allocation5 + $0x180] sm:$0xff]  ;;  %v186_v45 = vpack.c.b16 %v179_v37, %v179_v37  ;;  %v187_v46 = vpack.c.b16 %v180_v40, %v180_v40  ;;  %v889_v47 = vld [vmem:[#allocation5 + $0x128] sm:$0xff]  ;;  %v70_v51 = vld [vmem:[#allocation2 + $0x18] sm:$0xf] }
  0x1c   :  { %511 = vmatpush.bf16.msra.mxu1 %v864_v13  ;;  %v897_v48 = vld [vmem:[#allocation5 + $0x168] sm:$0xff]  ;;  %v888_v49 = vld [vmem:[#allocation5 + $0x120] sm:$0xff]  ;;  %v887_v52 = vld [vmem:[#allocation5 + $0x118] sm:$0xff]  ;;  %v183_v54 = vunpack.c.l.b16 %v70_v51 }
  0x1d   :  { %524 = vmatpush.bf16.msra.mxu2 %v872_v14  ;;  %v896_v50 = vld [vmem:[#allocation5 + $0x160] sm:$0xff]  ;;  %v895_v53 = vld [vmem:[#allocation5 + $0x158] sm:$0xff]  ;;  %v886_v55 = vld [vmem:[#allocation5 + $0x110] sm:$0xff] }
  0x1e   :  { %537 = vmatpush.bf16.msra.mxu3 %v880_v15  ;;  %v894_v56 = vld [vmem:[#allocation5 + $0x150] sm:$0xff]  ;;  %v190_v57 = vpack.c.b16 %v183_v54, %v183_v54  ;;  %v885_v58 = vld [vmem:[#allocation5 + $0x108] sm:$0xff]  ;;  %v884_v63 = vld [vmem:[#allocation5 + $0x100] sm:$0xff] }
  0x1f   :  { %499 = vmatpush.bf16.msra.mxu0 %v855_v16  ;;  %v893_v59 = vld [vmem:[#allocation5 + $0x148] sm:$0xff]  ;;  %v69_v60 = vld [vmem:[#allocation2 + $0x10] sm:$0xff]  ;;  %v892_v0 = vld [vmem:[#allocation5 + $0x140] sm:$0xff] }
  0x20   :  { %512 = vmatpush.bf16.msra.mxu1 %v863_v17  ;;  %v181_v61 = vunpack.c.l.b16 %v69_v60  ;;  %v182_v62 = vunpack.c.h.b16 %v69_v60  ;;  %v602_v3 = vld [vmem:[#allocation7 + $0x78] sm:$0xff]  ;;  %v601_v4 = vld [vmem:[#allocation7 + $0x70] sm:$0xff]  ;;  %v600_v5 = vld [vmem:[#allocation7 + $0x68] sm:$0xff] }
  0x21   :  { %525 = vmatpush.bf16.msra.mxu2 %v871_v18  ;;  %v599_v6 = vld [vmem:[#allocation7 + $0x60] sm:$0xff]  ;;  %v598_v7 = vld [vmem:[#allocation7 + $0x58] sm:$0xff]  ;;  %v597_v8 = vld [vmem:[#allocation7 + $0x50] sm:$0xff] }
  0x22   :  { %538 = vmatpush.bf16.msra.mxu3 %v879_v19  ;;  %v188_v1 = vpack.c.b16 %v181_v61, %v181_v61  ;;  %v189_v2 = vpack.c.b16 %v182_v62, %v182_v62  ;;  %v596_v9 = vld [vmem:[#allocation7 + $0x48] sm:$0xff]  ;;  %v595_v10 = vld [vmem:[#allocation7 + $0x40] sm:$0xff]  ;;  %v594_v11 = vld [vmem:[#allocation7 + $0x38] sm:$0xff] }
  0x23   :  { %500 = vmatpush.bf16.msra.mxu0 %v854_v20  ;;  %v593_v12 = vld [vmem:[#allocation7 + $0x30] sm:$0xff]  ;;  %v592_v13 = vld [vmem:[#allocation7 + $0x28] sm:$0xff]  ;;  %v591_v14 = vld [vmem:[#allocation7 + $0x20] sm:$0xff] }
  0x24   :  { %513 = vmatpush.bf16.msra.mxu1 %v862_v21  ;;  %v590_v15 = vld [vmem:[#allocation7 + $0x18] sm:$0xff]  ;;  %v589_v18 = vld [vmem:[#allocation7 + $0x10] sm:$0xff]  ;;  %v588_v19 = vld [vmem:[#allocation7 + $0x8] sm:$0xff] }
  0x25   :  { %526 = vmatpush.bf16.msra.mxu2 %v870_v22  ;;  %v587_v20 = vld [vmem:[#allocation7] sm:$0xff] }
  0x26   :  { %539 = vmatpush.bf16.msra.mxu3 %v878_v23 }
  0x27   :  { %501 = vmatpush.bf16.msra.mxu0 %v853_v24 }
  0x28   :  { %514 = vmatpush.bf16.msra.mxu1 %v861_v25  ;;  %v909_v25 = vld [vmem:[%s1075_s2] ss:$0 sm:$0xff]  ;;  %s1024_s2 = smov [#allocation8]  }
  0x29   :  { %527 = vmatpush.bf16.msra.mxu2 %v869_v27  ;;  %s642_s13 = sshll.u32 %s1024_s2, 4  ;;  %s643_s13 = int_to_ptr.vmem [resolvable:$true] %s642_s13 }
  0x2a   :  { %540 = vmatpush.bf16.msra.mxu3 %v877_v30 }
  0x2b   :  { %502 = vmatpush.bf16.msra.mxu0 %v852_v32 }
  0x2c   :  { %515 = vmatpush.bf16.msra.mxu1 %v860_v33 }
  0x2d   :  { %528 = vmatpush.bf16.msra.mxu2 %v868_v36 }
  0x2e   :  { %503 = vmatmul.bf16.vlgmr.msra.gmra.mxu0 %v184_v38  ;;  %541 = vmatpush.bf16.msra.mxu3 %v876_v41 }
  0x2f   :  { %547 = vmatpush.bf16.msrb.mxu0 %v891_v34  ;;  %516 = vmatmul.bf16.vlgmr.msra.gmra.mxu1 %v185_v39 }
  0x30   :  { %560 = vmatpush.bf16.msrb.mxu1 %v899_v35  ;;  %529 = vmatmul.bf16.vlgmr.msra.gmra.mxu2 %v186_v45 }
  0x31   :  { %580 = vmatpush.bf16.msrb.mxu2 %v900_v42  ;;  %542 = vmatmul.bf16.vlgmr.msra.gmra.mxu3 %v187_v46  ;;  %v910_v42 = vld [vmem:[%s1077_s4] ss:$0 sm:$0xff] }
  0x32   :  { %607 = vmatpush.msrb.mxu3 %v602_v3 }
  0x33   :  { %548 = vmatpush.bf16.msrb.mxu0 %v890_v43 }
  0x34   :  { %561 = vmatpush.bf16.msrb.mxu1 %v898_v44  ;;  %608 = vmatpush.msrb.mxu3 %v601_v4 }
  0x36   :  { %609 = vmatpush.msrb.mxu3 %v600_v5 }
  0x37   :  { %549 = vmatpush.bf16.msrb.mxu0 %v889_v47 }
  0x38   :  { %562 = vmatpush.bf16.msrb.mxu1 %v897_v48  ;;  %610 = vmatpush.msrb.mxu3 %v599_v6 }
  0x3a   :  { %611 = vmatpush.msrb.mxu3 %v598_v7 }
  0x3b   :  { %550 = vmatpush.bf16.msrb.mxu0 %v888_v49 }
  0x3c   :  { %563 = vmatpush.bf16.msrb.mxu1 %v896_v50  ;;  %612 = vmatpush.msrb.mxu3 %v597_v8 }
  0x3e   :  { %613 = vmatpush.msrb.mxu3 %v596_v9 }
  0x3f   :  { %551 = vmatpush.bf16.msrb.mxu0 %v887_v52 }
  0x40   :  { %564 = vmatpush.bf16.msrb.mxu1 %v895_v53  ;;  %851 = vmatmul.msk.bf16.vlgmr.msrb.gmra.mxu2 %vm491_vm0, %v190_v57 }
  0x41   :  { %614 = vmatpush.msrb.mxu3 %v595_v10 }
  0x43   :  { %552 = vmatpush.bf16.msrb.mxu0 %v886_v55  ;;  %615 = vmatpush.msrb.mxu3 %v594_v11 }
  0x44   :  { %565 = vmatpush.bf16.msrb.mxu1 %v894_v56 }
  0x45   :  { %616 = vmatpush.msrb.mxu3 %v593_v12 }
  0x47   :  { %553 = vmatpush.bf16.msrb.mxu0 %v885_v58  ;;  %617 = vmatpush.msrb.mxu3 %v592_v13 }
  0x48   :  { %566 = vmatpush.bf16.msrb.mxu1 %v893_v59 }
  0x49   :  { %618 = vmatpush.msrb.mxu3 %v591_v14 }
  0x4b   :  { %554 = vmatpush.bf16.msrb.mxu0 %v884_v63  ;;  %619 = vmatpush.msrb.mxu3 %v590_v15 }
  0x4c   :  { %567 = vmatpush.bf16.msrb.mxu1 %v892_v0 }
  0x4d   :  { %620 = vmatpush.msrb.mxu3 %v589_v18 }
  0x4e   :  { %555 = vmatmul.bf16.vlgmr.msrb.gmra.mxu0 %v188_v1 }
  0x4f   :  { %568 = vmatmul.bf16.vlgmr.msrb.gmra.mxu1 %v189_v2  ;;  %621 = vmatpush.msrb.mxu3 %v588_v19 }
  0x51   :  { %622 = vmatpush.msrb.mxu3 %v587_v20 }
  0xab   :  { %v504_v16 = vpop.f32.mrf.mxu0 }
  0xac   :  { %v517_v17 = vpop.f32.mrf.mxu1  ;;  %v505_v26 = vadd.f32 %v909_v25, %v504_v16 }
  0xae   :  { %v518_v29 = vadd.f32 %v517_v17, %v505_v26 }
  0xb3   :  { %v506_v21 = vpop.f32.mrf.mxu0  ;;  %v530_v23 = vpop.f32.mrf.mxu2 }
  0xb4   :  { %v519_v22 = vpop.f32.mrf.mxu1  ;;  %v543_v24 = vpop.f32.mrf.mxu3  ;;  %v531_v30 = vadd.f32 %v530_v23, %v518_v29 }
  0xb6   :  { %v544_v32 = vadd.f32 %v543_v24, %v531_v30 }
  0xbb   :  { %v532_v27 = vpop.f32.mrf.mxu2 }
  0xbc   :  { %v545_v28 = vpop.f32.mrf.mxu3 }
  0xc3   :  { %v582_v31 = vpop.f32.mrf.mxu2 }
  0xcb   :  { %v556_v33 = vpop.f32.mrf.mxu0  ;;  %v584_v37 = vpop.f32.mrf.mxu2 }
  0xcc   :  { %v569_v34 = vpop.f32.mrf.mxu1  ;;  %v557_v35 = vadd.f32 %v556_v33, %v544_v32 }
  0xce   :  { %v570_v36 = vadd.f32 %v569_v34, %v557_v35 }
  0xd0   :  { %v583_v38 = vadd.f32 %v582_v31, %v570_v36 }
  0xd2   :  { %v586_v39 = vmax.f32 %v583_v38, 0.0 }
  0xd3   :  { %v558_v40 = vpop.f32.mrf.mxu0 }
  0xd4   :  { %v571_v41 = vpop.f32.mrf.mxu1  ;;  %623 = vmatmul.f32.vlgmr.msrb.gmra.mxu3 %v586_v39 }
 0x157   :  { %v624_v43 = vpop.f32.mrf.mxu3 }
 0x158   :  { %v625_v44 = vadd.f32 %v910_v42, %v624_v43 }
 0x15a   :  { %627 = vmax.xlane.f32.xlu0 %v625_v44 }
 0x1cd   :  { %v628_v45 = vpop.xlane.xlu0 %627 }
 0x1ce   :  { %v629_v46 = vsub.f32 %v625_v44, %v628_v45 }
 0x1d0   :  { %v630_v47 = vmul.f32 1.442695, %v629_v46 }
 0x1d2   :  { %911 = vpow2.f32 %v630_v47 }
 0x1d8   :  { %v912_v48 = vpop.eup %911 }
 0x1d9   :  { %632 = vadd.xlane.f32.xlu0 %v912_v48 }
 0x24c   :  { %v633_v49 = vpop.xlane.xlu0 %632 }
 0x24d   :  { %913 = vrcp.f32 %v633_v49 }
 0x253   :  { %v914_v50 = vpop.eup %913 }
 0x254   :  { %v635_v51 = vmul.f32 %v914_v50, %v912_v48 }
 0x256   :  { %636 = vst [vmem:[#allocation8] sm:$0xff] %v635_v51 }
 0x257   :  { %647 = dma.vmem_to_hbm [thread:$0]  %s643_s13, 128, %s645_s16, [#allocation4]  }
 0x258   :  { %1015 = dma.done.wait [#allocation4], 128  }
 0x259   :  { %1016 = vsyncadd [#allocation4], 4294967168 }
 0x25a   :  { %652 = vsyncpa [#allocation3], 1 }
 0x25b   :  { %653 = vsyncpa [#allocation6], 1 }
 0x25c   :  { %654 = vsyncpa [#allocation4], 1 }

</bundles_post_ra>
